<compile_context>
chip_gen: v7x
topology: tpu7x:2x2x1
jax: 0.10.0
libtpu: 0.0.40
codegen_flags: <defaults>
</compile_context>

<pallas_src>
import functools

import jax
import jax.numpy as jnp
from jax.experimental import pallas as pl
from jax.experimental.pallas import tpu as pltpu


# --------------------------------------------------------------------------- #
# Kernels
# --------------------------------------------------------------------------- #
def _rope_mul_kernel(pos_ref, inv_ref, out_ref):
    # pos_ref: (TS, 1) f32, inv_ref: (1, dim_pad) f32, out_ref: (TS, dim_pad)
    # Pure VPU broadcast multiply; lane dim is a multiple of 128 (unmasked vst).
    out_ref[...] = (pos_ref[...] * inv_ref[...]).astype(out_ref.dtype)


def _rope_lane_dense_kernel(pos_ref, e_ref, out_ref, *, pack):
    # pos_ref: (TR, pack) f32 -- `pack` consecutive positions per output row
    # e_ref:   (pack, 128) f32 -- E[j, l] = inv_full[l % dim] * (l // dim == j)
    # out_ref: (TR, 128)       -- lane-dense slab; row r packs `pack` positions
    #
    # Exact VPU expansion: out = sum_j pos[:, j:j+1] * E[j].  Exactly one term
    # is non-zero per lane, the rest contribute +0.0, so the result is
    # bit-identical to the scalar f32 multiply of the reference.
    pos = pos_ref[...]
    e = e_ref[...]
    acc = pos[:, 0:1] * e[0:1, :]
    for j in range(1, pack):
        acc = acc + pos[:, j : j + 1] * e[j : j + 1, :]
    out_ref[...] = acc.astype(out_ref.dtype)


# --------------------------------------------------------------------------- #
# Tiling helpers
# --------------------------------------------------------------------------- #
def _vmem_block_budget_bytes():
    """Per-output-block budget. v5e/v6e (128 MiB VMEM) -> 8 MiB blocks;
    v7x / unknown (64 MiB VMEM, 32 MiB scoped) -> 4 MiB blocks."""
    try:
        kind = jax.devices()[0].device_kind.lower()
    except Exception:  # pragma: no cover - defensive only
        kind = ""
    if "v5" in kind or "v6" in kind:
        return 8 << 20
    return 4 << 20


def _seq_tile(n_rows, row_bytes, budget_bytes, min_steps=4):
    """Rows per output block: big enough to amortize the ~0.35us/step grid
    overhead, small enough for scoped VMEM (double-buffered), and split into
    >= min_steps grid steps when there is enough work so the "parallel" grid
    axis can be sharded across v7x's 2 TensorCores."""
    if n_rows <= 8:
        return n_rows
    cap = max(8, budget_bytes // max(row_bytes, 1))
    cap -= cap % 8
    if n_rows >= 8 * min_steps:
        per_step = -(-n_rows // min_steps)          # ceil(n_rows / min_steps)
        per_step = max(8, ((per_step + 7) // 8) * 8)
        cap = min(cap, per_step)
    cap = max(cap, 8)
    return n_rows if n_rows <= cap else cap


# --------------------------------------------------------------------------- #
# Wrapper
# --------------------------------------------------------------------------- #
def rotary_positional_embedding(positions, dim, max_seq_len=512,
                                out_dtype=jnp.float32):
    """positions: (S,) int/float array. Returns (S, dim) angle table."""
    del max_seq_len  # buffer-length bound only; not needed for forward
    assert dim % 2 == 0, "RoPE dim must be even"
    # Note: positions above 2**24 lose exactness under the f32 cast
    # (irrelevant for typical sequence lengths).
    s = positions.shape[0]
    pos_f = positions.astype(jnp.float32)

    inv_freq = 1.0 / (10000.0 ** (jnp.arange(0, dim, 2, dtype=jnp.float32) / dim))
    inv_full = jnp.concatenate([inv_freq, inv_freq])  # (dim,) -- dedup in wrapper

    params = pltpu.CompilerParams(dimension_semantics=("parallel",))
    budget = _vmem_block_budget_bytes()
    out_isize = jnp.dtype(out_dtype).itemsize

    pack = 128 // dim if (dim < 128 and 128 % dim == 0) else 1
    if pack > 16:  # dim < 8: unroll not worth it; use padded plain path
        pack = 1

    if pack > 1:
        # ---------------- lane-dense packed path ---------------- #
        s_pad = -(-s // pack) * pack
        if s_pad != s:
            pos_f = jnp.pad(pos_f, (0, s_pad - s))
        rows = s_pad // pack
        pos_packed = pos_f.reshape(rows, pack)

        # E[j, l] = inv_full[l % dim] if (l // dim == j) else 0   -> (pack, 128)
        lane = jnp.arange(128, dtype=jnp.int32)
        inv_tiled = jnp.tile(inv_full, pack)  # (128,)
        e = jnp.where((lane // dim)[None, :] == jnp.arange(pack)[:, None],
                      inv_tiled[None, :], 0.0).astype(jnp.float32)

        tr = _seq_tile(rows, 128 * out_isize, budget)
        kernel = functools.partial(_rope_lane_dense_kernel, pack=pack)
        out_slab = pl.pallas_call(
            kernel,
            out_shape=jax.ShapeDtypeStruct((rows, 128), out_dtype),
            grid=(pl.cdiv(rows, tr),),
            in_specs=[
                pl.BlockSpec((tr, pack), lambda i: (i, 0)),
                pl.BlockSpec((pack, 128), lambda i: (0, 0)),
            ],
            out_specs=pl.BlockSpec((tr, 128), lambda i: (i, 0)),
            compiler_params=params,
            cost_estimate=pl.CostEstimate(
                flops=2 * rows * 128,
                transcendentals=0,
                bytes_accessed=rows * 128 * out_isize + rows * pack * 4 + pack * 128 * 4,
            ),
        )(pos_packed, e)
        # Flat element order already matches (S, dim) row-major: pure reshape.
        out = out_slab.reshape(s_pad, dim)
        return out[:s] if s_pad != s else out

    # ---------------- plain path (dim >= 128 or non-packable) ---------------- #
    # Pad the lane axis to a multiple of 128 so every store is a full vst;
    # slice back in the wrapper (pure layout plumbing, outside the kernel).
    dim_pad = -(-dim // 128) * 128
    inv2d = (jnp.pad(inv_full, (0, dim_pad - dim)) if dim_pad != dim
             else inv_full).reshape(1, dim_pad)
    pos2d = pos_f.reshape(s, 1)
    ts = _seq_tile(s, dim_pad * out_isize, budget)
    out = pl.pallas_call(
        _rope_mul_kernel,
        out_shape=jax.ShapeDtypeStruct((s, dim_pad), out_dtype),
        grid=(pl.cdiv(s, ts),),
        in_specs=[
            pl.BlockSpec((ts, 1), lambda i: (i, 0)),
            pl.BlockSpec((1, dim_pad), lambda i: (0, 0)),
        ],
        out_specs=pl.BlockSpec((ts, dim_pad), lambda i: (i, 0)),
        compiler_params=params,
        cost_estimate=pl.CostEstimate(
            flops=s * dim_pad,
            transcendentals=0,
            bytes_accessed=s * dim_pad * out_isize + s * 4 + dim_pad * 4,
        ),
    )(pos2d, inv2d)
    return out[:, :dim] if dim_pad != dim else out


# --------------------------------------------------------------------------- #
# Reference + self-test
# --------------------------------------------------------------------------- #
def _reference(positions, dim):
    inv_freq = 1.0 / (10000.0 ** (jnp.arange(0, dim, 2, dtype=jnp.float32) / dim))
    freqs = jnp.einsum("i,j->ij", positions.astype(jnp.float32), inv_freq)
    return jnp.concatenate([freqs, freqs], axis=-1)


if __name__ == "__main__":
    key = jax.random.PRNGKey(0)
    seq = 8

    # Positions: permuted token positions to exercise arbitrary values.
    positions = jax.random.permutation(key, jnp.arange(seq, dtype=jnp.int32))

    # Case 1: small head_dim (lane-dense packed path, pack=4), dim=32.
    dim_small = 32
    emb = jax.block_until_ready(rotary_positional_embedding(positions, dim_small))
    ref = _reference(positions, dim_small)
    assert emb.shape == (seq, dim_small)
    assert emb.dtype == jnp.float32
    assert jnp.allclose(emb, ref, atol=1e-6, rtol=1e-6)

    # Case 2: dim=128 (plain path, naturally lane-dense).
    dim_big = 128
    emb2 = jax.block_until_ready(rotary_positional_embedding(positions, dim_big))
    assert emb2.shape == (seq, dim_big)
    assert jnp.allclose(emb2, _reference(positions, dim_big), atol=1e-6, rtol=1e-6)

    # Case 3: dim=48 (128 % 48 != 0) -> plain path with lane padding to 128.
    dim_odd = 48
    emb3 = jax.block_until_ready(rotary_positional_embedding(positions, dim_odd))
    assert emb3.shape == (seq, dim_odd)
    assert jnp.allclose(emb3, _reference(positions, dim_odd), atol=1e-6, rtol=1e-6)

    # Case 4: dim=64, seq=9 (seq % pack != 0) -> packed path with row padding.
    pos9 = jnp.arange(9, dtype=jnp.int32)[::-1]
    emb4 = jax.block_until_ready(rotary_positional_embedding(pos9, 64))
    assert emb4.shape == (9, 64)
    assert jnp.allclose(emb4, _reference(pos9, 64), atol=1e-6, rtol=1e-6)

    print("KERNEL_OK")
</pallas_src>

<mosaic_0001>
module attributes {stable_mosaic.version = 11 : i64} {
  func.func @_rope_lane_dense_kernel(%arg0: i32, %arg1: memref<2x4xf32, #tpu.memory_space<vmem>>, %arg2: memref<4x128xf32, #tpu.memory_space<vmem>>, %arg3: memref<2x128xf32, #tpu.memory_space<vmem>>) attributes {dimension_semantics = [#tpu.dimension_semantics<parallel>], iteration_bounds = array<i64: 1>, scalar_prefetch = 0 : i64, scratch_operands = 0 : i64, tpu.core_type = #tpu.core_type<tc>, window_params = [{transform_indices = @transform_0, window_bounds = array<i64: 2, 4>}, {pipeline_mode = #tpu.pipeline_mode<synchronous>, transform_indices = @transform_1, window_bounds = array<i64: 4, 128>}, {transform_indices = @transform_2, window_bounds = array<i64: 2, 128>}]} {
    %c0 = arith.constant 0 : index
    %c0_0 = arith.constant 0 : index
    %0 = vector.load %arg1[%c0, %c0_0] : memref<2x4xf32, #tpu.memory_space<vmem>>, vector<2x4xf32>
    %c0_1 = arith.constant 0 : index
    %c0_2 = arith.constant 0 : index
    %1 = vector.load %arg2[%c0_1, %c0_2] : memref<4x128xf32, #tpu.memory_space<vmem>>, vector<4x128xf32>
    %2 = vector.extract_strided_slice %0 {offsets = [0, 0], sizes = [2, 1], strides = [1, 1]} : vector<2x4xf32> to vector<2x1xf32>
    %3 = vector.extract_strided_slice %1 {offsets = [0, 0], sizes = [1, 128], strides = [1, 1]} : vector<4x128xf32> to vector<1x128xf32>
    %4 = vector.broadcast %2 : vector<2x1xf32> to vector<2x128xf32>
    %5 = vector.broadcast %3 : vector<1x128xf32> to vector<2x128xf32>
    %6 = arith.mulf %4, %5 : vector<2x128xf32>
    %7 = vector.extract_strided_slice %0 {offsets = [0, 1], sizes = [2, 1], strides = [1, 1]} : vector<2x4xf32> to vector<2x1xf32>
    %8 = vector.extract_strided_slice %1 {offsets = [1, 0], sizes = [1, 128], strides = [1, 1]} : vector<4x128xf32> to vector<1x128xf32>
    %9 = vector.broadcast %7 : vector<2x1xf32> to vector<2x128xf32>
    %10 = vector.broadcast %8 : vector<1x128xf32> to vector<2x128xf32>
    %11 = arith.mulf %9, %10 : vector<2x128xf32>
    %12 = arith.addf %6, %11 : vector<2x128xf32>
    %13 = vector.extract_strided_slice %0 {offsets = [0, 2], sizes = [2, 1], strides = [1, 1]} : vector<2x4xf32> to vector<2x1xf32>
    %14 = vector.extract_strided_slice %1 {offsets = [2, 0], sizes = [1, 128], strides = [1, 1]} : vector<4x128xf32> to vector<1x128xf32>
    %15 = vector.broadcast %13 : vector<2x1xf32> to vector<2x128xf32>
    %16 = vector.broadcast %14 : vector<1x128xf32> to vector<2x128xf32>
    %17 = arith.mulf %15, %16 : vector<2x128xf32>
    %18 = arith.addf %12, %17 : vector<2x128xf32>
    %19 = vector.extract_strided_slice %0 {offsets = [0, 3], sizes = [2, 1], strides = [1, 1]} : vector<2x4xf32> to vector<2x1xf32>
    %20 = vector.extract_strided_slice %1 {offsets = [3, 0], sizes = [1, 128], strides = [1, 1]} : vector<4x128xf32> to vector<1x128xf32>
    %21 = vector.broadcast %19 : vector<2x1xf32> to vector<2x128xf32>
    %22 = vector.broadcast %20 : vector<1x128xf32> to vector<2x128xf32>
    %23 = arith.mulf %21, %22 : vector<2x128xf32>
    %24 = arith.addf %18, %23 : vector<2x128xf32>
    %c0_3 = arith.constant 0 : index
    %c0_4 = arith.constant 0 : index
    %25 = vector.load %arg3[%c0_3, %c0_4] : memref<2x128xf32, #tpu.memory_space<vmem>>, vector<2x128xf32>
    tpu.vector_store %arg3[%c0_3, %c0_4], %24 {strides = array<i32>} : memref<2x128xf32, #tpu.memory_space<vmem>>, vector<2x128xf32>,
    return
  }
  func.func @transform_0(%arg0: i32) -> (i32, i32) {
    %c0_i32 = arith.constant 0 : i32
    %c0_i32_0 = arith.constant 0 : i32
    return %arg0, %c0_i32 : i32, i32
  }
  func.func @transform_1(%arg0: i32) -> (i32, i32) {
    %c0_i32 = arith.constant 0 : i32
    %c0_i32_0 = arith.constant 0 : i32
    %c0_i32_1 = arith.constant 0 : i32
    return %c0_i32, %c0_i32_0 : i32, i32
  }
  func.func @transform_2(%arg0: i32) -> (i32, i32) {
    %c0_i32 = arith.constant 0 : i32
    %c0_i32_0 = arith.constant 0 : i32
    return %arg0, %c0_i32 : i32, i32
  }
}

</mosaic_0001>

<bundles_post_ra>
// kernel: tpu_custom_call.1
= control target key start
LH: loop header
LB: loop body
LE: loop exit
PB: predicated region body
PF: predicated region fallthrough
CT: control target
= control target key end

     0   :  { %7 = vsyncpa [#allocation3], 0  ;;  %s237_s0 = inlined_call_operand.hbm [shape: f32[2,4], index: 0, kind: input, shape index: {}]   ;;  %s238_s1 = inlined_call_operand.hbm [shape: f32[4,128], index: 1, kind: input, shape index: {}]   ;;  %s239_s2 = inlined_call_operand.hbm [shape: f32[2,128], index: 2, kind: output, shape index: {}]  }
   0x1   :  { %8 = vsyncpa [#allocation6], 0 }
   0x2   :  { %9 = vsyncpa [#allocation4], 0  ;;  %s179_s9 = smov [#allocation2]   ;;  %s180_s11 = smov [#allocation5]  }
   0x3   :  { %s16_s10 = sshll.u32 %s179_s9, 4  ;;  %s26_s12 = sshll.u32 %s180_s11, 4  ;;  %s17_s10 = int_to_ptr.vmem [resolvable:$true] %s16_s10  ;;  %s27_s12 = int_to_ptr.vmem [resolvable:$true] %s26_s12 }
   0x4   :  { %s107_s15 = scalar_lea.hbm %s237_s0, 32 }
   0x5   :  { %p108_p0 = scmp.ne.s32.totalorder %s237_s0, %s107_s15  ;;  %p111_p1 = scmp.lt.u32.totalorder %s107_s15, %s237_s0 }
   0x7   :  { %p113_p2 = pnand %p111_p1, %p108_p0 }
   0x9   :  { %116 = shalt.err (!%p113_p2)
}
   0xa   :  { %s117_s20 = scalar_lea.vmem %s17_s10, 32  ;;  %p122_p4 = scmp.lt.s32.totalorder %s17_s10, %s17_s10 }
   0xb   :  { %p118_p3 = scmp.ne.s32.totalorder %s17_s10, %s117_s20  ;;  %p123_p5 = scmp.lt.s32.totalorder %s117_s20, %s117_s20 }
   0xd   :  { %p124_p6 = por %p123_p5, %p122_p4 }
   0xf   :  { %p125_p7 = pnand %p124_p6, %p118_p3 }
  0x11   :  { %128 = shalt.err (!%p125_p7)
}
  0x12   :  { %19 = dma.hbm_to_vmem [thread:$0]  %s237_s0, 32, %s17_s10, [#allocation3]  }
  0x13   :  { %s129_s25 = scalar_lea.hbm %s238_s1, 64 }
  0x14   :  { %p130_p8 = scmp.ne.s32.totalorder %s238_s1, %s129_s25  ;;  %p133_p9 = scmp.lt.u32.totalorder %s129_s25, %s238_s1 }
  0x16   :  { %p135_p10 = pnand %p133_p9, %p130_p8 }
  0x18   :  { %138 = shalt.err (!%p135_p10)
}
  0x19   :  { %s139_s30 = scalar_lea.vmem %s27_s12, 64  ;;  %p144_p12 = scmp.lt.s32.totalorder %s27_s12, %s27_s12 }
  0x1a   :  { %p140_p11 = scmp.ne.s32.totalorder %s27_s12, %s139_s30  ;;  %p145_p13 = scmp.lt.s32.totalorder %s139_s30, %s139_s30 }
  0x1c   :  { %p146_p0 = por %p145_p13, %p144_p12 }
  0x1e   :  { %p147_p1 = pnand %p146_p0, %p140_p11 }
  0x20   :  { %150 = shalt.err (!%p147_p1)
}
  0x21   :  { %29 = dma.hbm_to_vmem [thread:$0]  %s238_s1, 64, %s27_s12, [#allocation6]  }
  0x22   :  { %173 = dma.done.wait [#allocation3], 32  }
  0x23   :  { %174 = vsyncadd [#allocation3], 4294967264 }
  0x24   :  { %175 = dma.done.wait [#allocation6], 64  }
  0x25   :  { %176 = vsyncadd [#allocation6], 4294967232  ;;  %v181_v0 = vmov 0   ;;  %v182_v1 = vmov 2   ;;  %v36_v2 = vld [vmem:[#allocation2] sm:$0x3]  ;;  %v43_v5 = vlaneseq }
  0x26   :  { %102 = vset.pattern.permute.xlu0 %v181_v0  ;;  %104 = vset.pattern.permute.xlu1 %v182_v1  ;;  %v183_v3 = vmov 1   ;;  %v184_v4 = vmov 3   ;;  %v37_v9 = vld [vmem:[#allocation5] sm:$0xf]  ;;  %s185_s1 = smov [#allocation7]  }
  0x27   :  { %40 = vperm.xlu0 %102, %v36_v2   ;;  %59 = vperm.xlu1 %104, %v36_v2   ;;  %v44_v6 = vshrl.u32 %v43_v5, 7  ;;  %s85_s4 = sshll.u32 %s185_s1, 4  ;;  %s86_s4 = int_to_ptr.vmem [resolvable:$true] %s85_s4 }
  0x28   :  { %s151_s5 = scalar_lea.vmem %s86_s4, 32  ;;  %p156_p3 = scmp.lt.s32.totalorder %s86_s4, %s86_s4 }
  0x29   :  { %v45_v7 = vsub.s32 0, %v44_v6  ;;  %v54_v8 = vsub.s32 1, %v44_v6  ;;  %v64_v11 = vsub.s32 2, %v44_v6  ;;  %v74_v13 = vsub.s32 3, %v44_v6  ;;  %p152_p2 = scmp.ne.s32.totalorder %s86_s4, %s151_s5  ;;  %p157_p4 = scmp.lt.s32.totalorder %s151_s5, %s151_s5 }
  0x2b   :  { %103 = vset.pattern.permute.xlu0 %v183_v3  ;;  %105 = vset.pattern.permute.xlu1 %v184_v4  ;;  %v46_v14 = vrot.slane %v37_v9, %v45_v7  ;;  %v55_v15 = vrot.slane %v37_v9, %v54_v8  ;;  %v65_v16 = vrot.slane %v37_v9, %v64_v11  ;;  %p158_p5 = por %p157_p4, %p156_p3 }
  0x2c   :  { %49 = vperm.xlu0 %103, %v36_v2   ;;  %69 = vperm.xlu1 %105, %v36_v2   ;;  %v75_v17 = vrot.slane %v37_v9, %v74_v13 }
  0x2d   :  { %p159_p6 = pnand %p158_p5, %p152_p2 }
  0x30   :  { %106 = vset.pattern.permute.xlu0 %v184_v4 }
  0xa6   :  { %v41_v10 = vpop.permute.xlu0 %40  ;;  %v60_v12 = vpop.permute.xlu1 %59 }
  0xa7   :  { %v47_v20 = vmul.f32 %v46_v14, %v41_v10  ;;  %v66_v22 = vmul.f32 %v65_v16, %v60_v12 }
  0xab   :  { %v50_v18 = vpop.permute.xlu0 %49  ;;  %v70_v19 = vpop.permute.xlu1 %69 }
  0xac   :  { %v56_v21 = vmul.f32 %v55_v15, %v50_v18  ;;  %v76_v24 = vmul.f32 %v75_v17, %v70_v19 }
  0xae   :  { %v57_v23 = vadd.f32 %v56_v21, %v47_v20 }
  0xb0   :  { %v67_v25 = vadd.f32 %v66_v22, %v57_v23 }
  0xb2   :  { %v77_v26 = vadd.f32 %v76_v24, %v67_v25 }
  0xb4   :  { %78 = vst [vmem:[#allocation7] sm:$0x3] %v77_v26 }
  0xb5   :  { %162 = shalt.err (!%p159_p6)
}
  0xb6   :  { %s163_s8 = scalar_lea.hbm %s239_s2, 32 }
  0xb7   :  { %p164_p7 = scmp.ne.s32.totalorder %s239_s2, %s163_s8  ;;  %p167_p8 = scmp.lt.u32.totalorder %s163_s8, %s239_s2 }
  0xb9   :  { %p169_p9 = pnand %p167_p8, %p164_p7 }
  0xbb   :  { %172 = shalt.err (!%p169_p9)
}
  0xbc   :  { %88 = dma.vmem_to_hbm [thread:$0]  %s86_s4, 32, %s239_s2, [#allocation4]  }
  0xbd   :  { %177 = dma.done.wait [#allocation4], 32  }
  0xbe   :  { %178 = vsyncadd [#allocation4], 4294967264 }
  0xbf   :  { %92 = vsyncpa [#allocation3], 1 }
  0xc0   :  { %93 = vsyncpa [#allocation6], 1 }
  0xc1   :  { %94 = vsyncpa [#allocation4], 1 }

</bundles_post_ra>
